<compile_context>
chip_gen: v7x
topology: tpu7x:2x2x1
jax: 0.10.0
libtpu: 0.0.40
codegen_flags: <defaults>
</compile_context>

<pallas_src>
import functools

import jax
import jax.numpy as jnp
from jax.experimental import pallas as pl
from jax.experimental.pallas import tpu as pltpu


def _layer_scale_kernel(scale_ref, x_ref, o_ref, *, tc_c):
    # scale_ref: f32[C] in SMEM (whole array, resident across grid steps)
    # x_ref / o_ref: (tc_c, th, W) VMEM blocks (N dim squeezed away)
    c0 = pl.program_id(1) * tc_c  # first channel of this block
    for j in range(tc_c):  # static unroll; tc_c is capped small
        s = scale_ref[c0 + j]  # f32 scalar
        o_ref[j] = (x_ref[j].astype(jnp.float32) * s).astype(o_ref.dtype)


def _tensorcores_per_chip():
    """Best-effort TensorCores-per-device (2 on megacore-style chips: v4/v5p/v7x)."""
    try:
        kind = jax.devices()[0].device_kind.lower()
    except Exception:
        return 1
    if "lite" in kind or "v5e" in kind or "v6e" in kind:
        return 1
    if any(t in kind for t in ("v7", "7x", "v4", "v5p")):
        return 2
    return 1


def _pick_blocks(N, C, H, W, itemsize, min_steps, max_tile_bytes, max_unroll=64):
    """Channel block tc_c (divides C) and H block th (== H or 8-aligned divisor of H)."""
    lane_w = -(-W // 128) * 128  # lane padding of the last dim in VMEM

    def slab_bytes(th):  # padded VMEM bytes of one (th, W) channel slab
        return (-(-th // 8) * 8) * lane_w * itemsize

    # Split H only if even a single-channel full plane blows the tile budget.
    th = H
    if slab_bytes(H) > max_tile_bytes:
        cands = [t for t in range(8, H, 8) if H % t == 0]
        fitting = [t for t in cands if slab_bytes(t) <= max_tile_bytes]
        if fitting:
            th = max(fitting)
        elif cands:
            th = min(cands)  # best effort; still 8-aligned so layout-legal
        # else: H has no 8-aligned divisor; keep full H (layout-legal, may be large)

    divisors = [d for d in range(1, C + 1) if C % d == 0]
    fit = [d for d in divisors
           if d <= max_unroll and d * slab_bytes(th) <= max_tile_bytes] or [1]
    steps_ok = [d for d in fit if N * (C // d) * (H // th) >= min_steps]
    tc_c = max(steps_ok) if steps_ok else max(fit)
    return tc_c, th


def layer_scale_mul(scale, x, *, max_tile_bytes=2 << 20):
    """Computes scale[C,1,1] * x[N,C,H,W] (broadcast multiply), like the PyTorch module."""
    N, C, H, W = x.shape
    itemsize = jnp.dtype(x.dtype).itemsize

    # Flat f32 per-channel scale for SMEM residence; multiply happens in f32.
    scale_vec = scale.reshape(C).astype(jnp.float32)

    ncores = _tensorcores_per_chip()
    min_steps = 2 * ncores  # >=2 steps/core so in-DMA(i+1) overlaps out-DMA(i)

    tc_c, th = _pick_blocks(N, C, H, W, itemsize, min_steps, max_tile_bytes)
    grid = (N, C // tc_c, H // th)

    kernel = functools.partial(_layer_scale_kernel, tc_c=tc_c)

    cost = pl.CostEstimate(
        flops=N * C * H * W,
        transcendentals=0,
        bytes_accessed=2 * N * C * H * W * itemsize + C * 4,
    )

    out = pl.pallas_call(
        kernel,
        out_shape=jax.ShapeDtypeStruct(x.shape, x.dtype),
        grid_spec=pltpu.PrefetchScalarGridSpec(
            num_scalar_prefetch=0,
            grid=grid,
            in_specs=[
                # scale: whole array, resident in SMEM (no per-step DMA)
                pl.BlockSpec(memory_space=pltpu.MemorySpace.SMEM),
                # x: native NCHW tiling; last two block dims are full W and
                # either full H or an 8-aligned H slab -> layout-legal, no relayout
                pl.BlockSpec((None, tc_c, th, W), lambda n, c, h: (n, c, h, 0)),
            ],
            out_specs=pl.BlockSpec((None, tc_c, th, W), lambda n, c, h: (n, c, h, 0)),
        ),
        compiler_params=pltpu.CompilerParams(
            dimension_semantics=("parallel", "parallel", "parallel"),
        ),
        cost_estimate=cost,
    )(scale_vec, x)
    return out


if __name__ == "__main__":
    key = jax.random.PRNGKey(0)
    kx, ks = jax.random.split(key)

    # Small shapes consistent with the module (ConvNeXt layer-scale on NCHW).
    N, C, H, W = 2, 8, 16, 16
    x = jax.random.normal(kx, (N, C, H, W), dtype=jnp.float32)
    layer_scale0 = jax.random.uniform(ks, (C, 1, 1), dtype=jnp.float32)  # torch.rand -> U[0,1)

    out = jax.block_until_ready(layer_scale_mul(layer_scale0, x))
    ref = layer_scale0.reshape(1, C, 1, 1) * x
    assert out.shape == x.shape and out.dtype == x.dtype
    assert jnp.allclose(out, ref, rtol=1e-6, atol=1e-6)

    # Also exercise the original module's shape: x14 [1,128,56,56], layer_scale0 [128,1,1].
    N2, C2, H2, W2 = 1, 128, 56, 56
    x2 = jax.random.normal(kx, (N2, C2, H2, W2), dtype=jnp.float32)
    s2 = jax.random.uniform(ks, (C2, 1, 1), dtype=jnp.float32)
    out2 = jax.block_until_ready(layer_scale_mul(s2, x2))
    ref2 = s2.reshape(1, C2, 1, 1) * x2
    assert out2.shape == x2.shape and out2.dtype == x2.dtype
    assert jnp.allclose(out2, ref2, rtol=1e-6, atol=1e-6)

    print("KERNEL_OK")
</pallas_src>

<mosaic_0001>
module attributes {stable_mosaic.version = 11 : i64} {
  func.func @_layer_scale_kernel(%arg0: i32, %arg1: i32, %arg2: i32, %arg3: memref<8xf32, #tpu.memory_space<smem>>, %arg4: memref<1x8x16x16xf32, #tpu.memory_space<vmem>>, %arg5: memref<1x8x16x16xf32, #tpu.memory_space<vmem>>) attributes {dimension_semantics = [#tpu.dimension_semantics<parallel>, #tpu.dimension_semantics<parallel>, #tpu.dimension_semantics<parallel>], iteration_bounds = array<i64: 2, 1, 1>, scalar_prefetch = 0 : i64, scratch_operands = 0 : i64, tpu.core_type = #tpu.core_type<tc>, window_params = [{transform_indices = @transform_0, window_bounds = array<i64: 8>}, {transform_indices = @transform_1, window_bounds = array<i64: 1, 8, 16, 16>}, {transform_indices = @transform_2, window_bounds = array<i64: 1, 8, 16, 16>}]} {
    %c8_i32 = arith.constant 8 : i32
    %0 = arith.muli %arg1, %c8_i32 : i32
    %c0_i32 = arith.constant 0 : i32
    %1 = arith.addi %0, %c0_i32 : i32
    %2 = arith.index_cast %1 : i32 to index
    %3 = memref.load %arg3[%2] : memref<8xf32, #tpu.memory_space<smem>>
    %c0 = arith.constant 0 : index
    %c0_0 = arith.constant 0 : index
    %c0_1 = arith.constant 0 : index
    %c0_2 = arith.constant 0 : index
    %4 = vector.load %arg4[%c0, %c0_0, %c0_1, %c0_2] : memref<1x8x16x16xf32, #tpu.memory_space<vmem>>, vector<1x1x16x16xf32>
    %5 = vector.shape_cast %4 : vector<1x1x16x16xf32> to vector<16x16xf32>
    %6 = vector.broadcast %3 : f32 to vector<16x16xf32>
    %7 = arith.mulf %5, %6 : vector<16x16xf32>
    %c0_3 = arith.constant 0 : index
    %c0_4 = arith.constant 0 : index
    %c0_5 = arith.constant 0 : index
    %c0_6 = arith.constant 0 : index
    %8 = vector.load %arg5[%c0_3, %c0_4, %c0_5, %c0_6] : memref<1x8x16x16xf32, #tpu.memory_space<vmem>>, vector<1x1x16x16xf32>
    %9 = vector.shape_cast %8 : vector<1x1x16x16xf32> to vector<16x16xf32>
    %10 = vector.shape_cast %7 : vector<16x16xf32> to vector<1x1x16x16xf32>
    tpu.vector_store %arg5[%c0_3, %c0_4, %c0_5, %c0_6], %10 {strides = array<i32>} : memref<1x8x16x16xf32, #tpu.memory_space<vmem>>, vector<1x1x16x16xf32>,
    %c1_i32 = arith.constant 1 : i32
    %11 = arith.addi %0, %c1_i32 : i32
    %12 = arith.index_cast %11 : i32 to index
    %13 = memref.load %arg3[%12] : memref<8xf32, #tpu.memory_space<smem>>
    %c0_7 = arith.constant 0 : index
    %c1 = arith.constant 1 : index
    %c0_8 = arith.constant 0 : index
    %c0_9 = arith.constant 0 : index
    %14 = vector.load %arg4[%c0_7, %c1, %c0_8, %c0_9] : memref<1x8x16x16xf32, #tpu.memory_space<vmem>>, vector<1x1x16x16xf32>
    %15 = vector.shape_cast %14 : vector<1x1x16x16xf32> to vector<16x16xf32>
    %16 = vector.broadcast %13 : f32 to vector<16x16xf32>
    %17 = arith.mulf %15, %16 : vector<16x16xf32>
    %c0_10 = arith.constant 0 : index
    %c1_11 = arith.constant 1 : index
    %c0_12 = arith.constant 0 : index
    %c0_13 = arith.constant 0 : index
    %18 = vector.load %arg5[%c0_10, %c1_11, %c0_12, %c0_13] : memref<1x8x16x16xf32, #tpu.memory_space<vmem>>, vector<1x1x16x16xf32>
    %19 = vector.shape_cast %18 : vector<1x1x16x16xf32> to vector<16x16xf32>
    %20 = vector.shape_cast %17 : vector<16x16xf32> to vector<1x1x16x16xf32>
    tpu.vector_store %arg5[%c0_10, %c1_11, %c0_12, %c0_13], %20 {strides = array<i32>} : memref<1x8x16x16xf32, #tpu.memory_space<vmem>>, vector<1x1x16x16xf32>,
    %c2_i32 = arith.constant 2 : i32
    %21 = arith.addi %0, %c2_i32 : i32
    %22 = arith.index_cast %21 : i32 to index
    %23 = memref.load %arg3[%22] : memref<8xf32, #tpu.memory_space<smem>>
    %c0_14 = arith.constant 0 : index
    %c2 = arith.constant 2 : index
    %c0_15 = arith.constant 0 : index
    %c0_16 = arith.constant 0 : index
    %24 = vector.load %arg4[%c0_14, %c2, %c0_15, %c0_16] : memref<1x8x16x16xf32, #tpu.memory_space<vmem>>, vector<1x1x16x16xf32>
    %25 = vector.shape_cast %24 : vector<1x1x16x16xf32> to vector<16x16xf32>
    %26 = vector.broadcast %23 : f32 to vector<16x16xf32>
    %27 = arith.mulf %25, %26 : vector<16x16xf32>
    %c0_17 = arith.constant 0 : index
    %c2_18 = arith.constant 2 : index
    %c0_19 = arith.constant 0 : index
    %c0_20 = arith.constant 0 : index
    %28 = vector.load %arg5[%c0_17, %c2_18, %c0_19, %c0_20] : memref<1x8x16x16xf32, #tpu.memory_space<vmem>>, vector<1x1x16x16xf32>
    %29 = vector.shape_cast %28 : vector<1x1x16x16xf32> to vector<16x16xf32>
    %30 = vector.shape_cast %27 : vector<16x16xf32> to vector<1x1x16x16xf32>
    tpu.vector_store %arg5[%c0_17, %c2_18, %c0_19, %c0_20], %30 {strides = array<i32>} : memref<1x8x16x16xf32, #tpu.memory_space<vmem>>, vector<1x1x16x16xf32>,
    %c3_i32 = arith.constant 3 : i32
    %31 = arith.addi %0, %c3_i32 : i32
    %32 = arith.index_cast %31 : i32 to index
    %33 = memref.load %arg3[%32] : memref<8xf32, #tpu.memory_space<smem>>
    %c0_21 = arith.constant 0 : index
    %c3 = arith.constant 3 : index
    %c0_22 = arith.constant 0 : index
    %c0_23 = arith.constant 0 : index
    %34 = vector.load %arg4[%c0_21, %c3, %c0_22, %c0_23] : memref<1x8x16x16xf32, #tpu.memory_space<vmem>>, vector<1x1x16x16xf32>
    %35 = vector.shape_cast %34 : vector<1x1x16x16xf32> to vector<16x16xf32>
    %36 = vector.broadcast %33 : f32 to vector<16x16xf32>
    %37 = arith.mulf %35, %36 : vector<16x16xf32>
    %c0_24 = arith.constant 0 : index
    %c3_25 = arith.constant 3 : index
    %c0_26 = arith.constant 0 : index
    %c0_27 = arith.constant 0 : index
    %38 = vector.load %arg5[%c0_24, %c3_25, %c0_26, %c0_27] : memref<1x8x16x16xf32, #tpu.memory_space<vmem>>, vector<1x1x16x16xf32>
    %39 = vector.shape_cast %38 : vector<1x1x16x16xf32> to vector<16x16xf32>
    %40 = vector.shape_cast %37 : vector<16x16xf32> to vector<1x1x16x16xf32>
    tpu.vector_store %arg5[%c0_24, %c3_25, %c0_26, %c0_27], %40 {strides = array<i32>} : memref<1x8x16x16xf32, #tpu.memory_space<vmem>>, vector<1x1x16x16xf32>,
    %c4_i32 = arith.constant 4 : i32
    %41 = arith.addi %0, %c4_i32 : i32
    %42 = arith.index_cast %41 : i32 to index
    %43 = memref.load %arg3[%42] : memref<8xf32, #tpu.memory_space<smem>>
    %c0_28 = arith.constant 0 : index
    %c4 = arith.constant 4 : index
    %c0_29 = arith.constant 0 : index
    %c0_30 = arith.constant 0 : index
    %44 = vector.load %arg4[%c0_28, %c4, %c0_29, %c0_30] : memref<1x8x16x16xf32, #tpu.memory_space<vmem>>, vector<1x1x16x16xf32>
    %45 = vector.shape_cast %44 : vector<1x1x16x16xf32> to vector<16x16xf32>
    %46 = vector.broadcast %43 : f32 to vector<16x16xf32>
    %47 = arith.mulf %45, %46 : vector<16x16xf32>
    %c0_31 = arith.constant 0 : index
    %c4_32 = arith.constant 4 : index
    %c0_33 = arith.constant 0 : index
    %c0_34 = arith.constant 0 : index
    %48 = vector.load %arg5[%c0_31, %c4_32, %c0_33, %c0_34] : memref<1x8x16x16xf32, #tpu.memory_space<vmem>>, vector<1x1x16x16xf32>
    %49 = vector.shape_cast %48 : vector<1x1x16x16xf32> to vector<16x16xf32>
    %50 = vector.shape_cast %47 : vector<16x16xf32> to vector<1x1x16x16xf32>
    tpu.vector_store %arg5[%c0_31, %c4_32, %c0_33, %c0_34], %50 {strides = array<i32>} : memref<1x8x16x16xf32, #tpu.memory_space<vmem>>, vector<1x1x16x16xf32>,
    %c5_i32 = arith.constant 5 : i32
    %51 = arith.addi %0, %c5_i32 : i32
    %52 = arith.index_cast %51 : i32 to index
    %53 = memref.load %arg3[%52] : memref<8xf32, #tpu.memory_space<smem>>
    %c0_35 = arith.constant 0 : index
    %c5 = arith.constant 5 : index
    %c0_36 = arith.constant 0 : index
    %c0_37 = arith.constant 0 : index
    %54 = vector.load %arg4[%c0_35, %c5, %c0_36, %c0_37] : memref<1x8x16x16xf32, #tpu.memory_space<vmem>>, vector<1x1x16x16xf32>
    %55 = vector.shape_cast %54 : vector<1x1x16x16xf32> to vector<16x16xf32>
    %56 = vector.broadcast %53 : f32 to vector<16x16xf32>
    %57 = arith.mulf %55, %56 : vector<16x16xf32>
    %c0_38 = arith.constant 0 : index
    %c5_39 = arith.constant 5 : index
    %c0_40 = arith.constant 0 : index
    %c0_41 = arith.constant 0 : index
    %58 = vector.load %arg5[%c0_38, %c5_39, %c0_40, %c0_41] : memref<1x8x16x16xf32, #tpu.memory_space<vmem>>, vector<1x1x16x16xf32>
    %59 = vector.shape_cast %58 : vector<1x1x16x16xf32> to vector<16x16xf32>
    %60 = vector.shape_cast %57 : vector<16x16xf32> to vector<1x1x16x16xf32>
    tpu.vector_store %arg5[%c0_38, %c5_39, %c0_40, %c0_41], %60 {strides = array<i32>} : memref<1x8x16x16xf32, #tpu.memory_space<vmem>>, vector<1x1x16x16xf32>,
    %c6_i32 = arith.constant 6 : i32
    %61 = arith.addi %0, %c6_i32 : i32
    %62 = arith.index_cast %61 : i32 to index
    %63 = memref.load %arg3[%62] : memref<8xf32, #tpu.memory_space<smem>>
    %c0_42 = arith.constant 0 : index
    %c6 = arith.constant 6 : index
    %c0_43 = arith.constant 0 : index
    %c0_44 = arith.constant 0 : index
    %64 = vector.load %arg4[%c0_42, %c6, %c0_43, %c0_44] : memref<1x8x16x16xf32, #tpu.memory_space<vmem>>, vector<1x1x16x16xf32>
    %65 = vector.shape_cast %64 : vector<1x1x16x16xf32> to vector<16x16xf32>
    %66 = vector.broadcast %63 : f32 to vector<16x16xf32>
    %67 = arith.mulf %65, %66 : vector<16x16xf32>
    %c0_45 = arith.constant 0 : index
    %c6_46 = arith.constant 6 : index
    %c0_47 = arith.constant 0 : index
    %c0_48 = arith.constant 0 : index
    %68 = vector.load %arg5[%c0_45, %c6_46, %c0_47, %c0_48] : memref<1x8x16x16xf32, #tpu.memory_space<vmem>>, vector<1x1x16x16xf32>
    %69 = vector.shape_cast %68 : vector<1x1x16x16xf32> to vector<16x16xf32>
    %70 = vector.shape_cast %67 : vector<16x16xf32> to vector<1x1x16x16xf32>
    tpu.vector_store %arg5[%c0_45, %c6_46, %c0_47, %c0_48], %70 {strides = array<i32>} : memref<1x8x16x16xf32, #tpu.memory_space<vmem>>, vector<1x1x16x16xf32>,
    %c7_i32 = arith.constant 7 : i32
    %71 = arith.addi %0, %c7_i32 : i32
    %72 = arith.index_cast %71 : i32 to index
    %73 = memref.load %arg3[%72] : memref<8xf32, #tpu.memory_space<smem>>
    %c0_49 = arith.constant 0 : index
    %c7 = arith.constant 7 : index
    %c0_50 = arith.constant 0 : index
    %c0_51 = arith.constant 0 : index
    %74 = vector.load %arg4[%c0_49, %c7, %c0_50, %c0_51] : memref<1x8x16x16xf32, #tpu.memory_space<vmem>>, vector<1x1x16x16xf32>
    %75 = vector.shape_cast %74 : vector<1x1x16x16xf32> to vector<16x16xf32>
    %76 = vector.broadcast %73 : f32 to vector<16x16xf32>
    %77 = arith.mulf %75, %76 : vector<16x16xf32>
    %c0_52 = arith.constant 0 : index
    %c7_53 = arith.constant 7 : index
    %c0_54 = arith.constant 0 : index
    %c0_55 = arith.constant 0 : index
    %78 = vector.load %arg5[%c0_52, %c7_53, %c0_54, %c0_55] : memref<1x8x16x16xf32, #tpu.memory_space<vmem>>, vector<1x1x16x16xf32>
    %79 = vector.shape_cast %78 : vector<1x1x16x16xf32> to vector<16x16xf32>
    %80 = vector.shape_cast %77 : vector<16x16xf32> to vector<1x1x16x16xf32>
    tpu.vector_store %arg5[%c0_52, %c7_53, %c0_54, %c0_55], %80 {strides = array<i32>} : memref<1x8x16x16xf32, #tpu.memory_space<vmem>>, vector<1x1x16x16xf32>,
    return
  }
  func.func @transform_0(%arg0: i32, %arg1: i32, %arg2: i32) -> i32 {
    %c0_i32 = arith.constant 0 : i32
    %c0_i32_0 = arith.constant 0 : i32
    return %c0_i32 : i32
  }
  func.func @transform_1(%arg0: i32, %arg1: i32, %arg2: i32) -> (i32, i32, i32, i32) {
    %c0_i32 = arith.constant 0 : i32
    %c0_i32_0 = arith.constant 0 : i32
    return %arg0, %arg1, %arg2, %c0_i32 : i32, i32, i32, i32
  }
  func.func @transform_2(%arg0: i32, %arg1: i32, %arg2: i32) -> (i32, i32, i32, i32) {
    %c0_i32 = arith.constant 0 : i32
    %c0_i32_0 = arith.constant 0 : i32
    return %arg0, %arg1, %arg2, %c0_i32 : i32, i32, i32, i32
  }
}

</mosaic_0001>

<bundles_post_ra>
// kernel: tpu_custom_call.1
= control target key start
LH: loop header
LB: loop body
LE: loop exit
PB: predicated region body
PF: predicated region fallthrough
CT: control target
= control target key end

     0   :  { %7 = vsyncpa [#allocation5], 0  ;;  %s979_s0 = inlined_call_operand.hbm [shape: f32[8], index: 0, kind: input, shape index: {}]   ;;  %s980_s1 = inlined_call_operand.hbm [shape: f32[2,8,16,16], index: 1, kind: input, shape index: {}]   ;;  %s981_s2 = inlined_call_operand.hbm [shape: f32[2,8,16,16], index: 2, kind: output, shape index: {}]  }
   0x1   :  { %8 = vsyncpa [#allocation3], 0 }
   0x2   :  { %10 = vsyncpa [#allocation3 + $0x1], 0 }
   0x3   :  { %11 = vsyncpa [#allocation4], 0 }
   0x4   :  { %13 = vsyncpa [#allocation4 + $0x1], 0  ;;  %s706_s9 = smov 0   ;;  %s708_s10 = smov 0  }
   0x5   :  { %s710_s11 = smov 0   ;;  %s712_s12 = smov 0  }
   0x6   :  { %s714_s13 = smov 0   ;;  %s716_s14 = smov 0  }
   0x7 LB: > { %s422_s15 = sadd.s32 4294967295, %s682_s14   ;;  %s423_s16 = sadd.s32 4294967294, %s682_s14   ;;  %s682_s14 = sphi %s716_s14, %s19_s14   ;;  %s678_s13 = sphi %s714_s13, %s1001_s13   ;;  %s674_s12 = sphi %s712_s12, %s1000_s12   ;;  %s670_s11 = sphi %s710_s11, %s999_s11   ;;  %s666_s10 = sphi %s708_s10, %s998_s10   ;;  %s662_s9 = sphi %s706_s9, %s997_s9  }
   0x8   : > { %s70_s17 = sadd.s32 1, %s670_s11  ;;  %p77_p0 = scmp.ne.s32.totalorder %s670_s11, %s666_s10 }
   0x9   : > { %p78_p1 = scmp.eq.s32.totalorder %s682_s14, 0  ;;  %p83_p2 = scmp.ne.s32.totalorder %s666_s10, %s662_s9 }
   0xa   : > { %p744_p3 = scmp.eq.s32.totalorder %s422_s15, 0  ;;  %p111_p4 = scmp.eq.s32.totalorder %s422_s15, 1 }
   0xb   : > { %p79_p5 = por %p78_p1, %p77_p0  ;;  %p117_p6 = scmp.eq.s32.totalorder %s423_s16, 1 }
   0xc   : > { %s986_s18 = scalar_select %p744_p3, 1, 0 }
   0xd   : > { %p750_p7 = por %p744_p3, %p83_p2  ;;  %p754_p8 = por %p111_p4, %p77_p0 }
   0xe   : > { %p758_p9 = por %p117_p6, %p83_p2  ;;  %p424_p10 = scmp.ge.s32.totalorder %s682_s14, 1 }
   0xf   : > { %s987_s19 = scalar_select %p750_p7, 1, 0 }
  0x10   : > { %s988_s20 = scalar_select %p754_p8, 1, 0 }
  0x11   : > { %s989_s21 = scalar_select %p758_p9, 1, 0 }
  0x12   : > { %p124_p11 = scmp.lt.s32.totalorder %s682_s14, 3  ;;  %p497_p1 = scmp.lt.s32.totalorder %s682_s14, 2 }
  0x13   : > { %s146_s23 = sand.u32 1, %s670_s11   ;;  %s38_s25 = sadd.s32 1, %s678_s13 }
  0x14   : > { %p765_p13 = pnand %p424_p10, %p124_p11  ;;  %p773_p0 = pnand %p497_p1, %p79_p5 }
  0x15   : > { %s427_s26 = sshll.u32 %s146_s23, 7  ;;  %p40_p4 = scmp.ge.s32.totalorder %s38_s25, 2 }
  0x16   : > { %p484_p7 = pneg %p765_p13  ;;  %s553_s29 = scalar_lea.hbm %s979_s0, 16 }
  0x17   : > { %p554_p6 = scmp.ne.s32.totalorder %s979_s0, %s553_s29  ;;  %p560_p5 = scmp.lt.u32.totalorder %s553_s29, %s979_s0 }
  0x18   : > { %p485_p2 = pnand %p484_p7, %p744_p3 }
  0x1a   : > { %p555_p10 = pneg %p485_p2 }
  0x1c   : > { %p556_p11 = pnand %p555_p10, %p554_p6 }
  0x1e   : > { %p557_p12 = pneg %p556_p11 }
  0x20   : > { %p562_p1 = pnand %p560_p5, %p557_p12 }
  0x22   : > { %565 = shalt.err (!%p562_p1)
}
  0x23   : > { %s684_s6 = smov [#allocation2]   ;;  %s1003_s25 = smov (%p40_p4, %s38_s25), 0 }
  0x24   : > { %487 = dma.hbm_to_smem (!%p485_p2), %s979_s0, 16, %s684_s6, [#allocation5]  }
  0x25   : > { %s474_s15 = sshll.u32 %s678_s13, 11  ;;  %s63_s16 = ssub.s32 %s678_s13, %s1003_s25 }
  0x26   : > { %s800_s29 = scalar_lea.hbm %s980_s1, %s474_s15  ;;  %p68_p7 = scmp.eq.s32.totalorder %s63_s16, 0 }
  0x27   : > { %s150_s30 = scalar_lea.vmem [#allocation6], %s427_s26  ;;  %s809_s5 = scalar_lea.sflag [#allocation3], %s146_s23 }
  0x28   : > { %s162_s3 = sshll.u32 %s150_s30, 4  ;;  %s566_s6 = scalar_lea.hbm %s800_s29, 2048  ;;  %s802_s3 = int_to_ptr.vmem [resolvable:$true] %s162_s3 }
  0x29   : > { %s807_s4 = scalar_select %p68_p7, %s670_s11, %s70_s17  }
  0x2a   : > { %p567_p12 = scmp.ne.s32.totalorder %s800_s29, %s566_s6  ;;  %p568_p2 = pneg %p773_p0 }
  0x2b   : > { %s571_s26 = scalar_lea.hbm %s980_s1, 4096  ;;  %p572_p10 = scmp.lt.u32.totalorder %s800_s29, %s980_s1 }
  0x2c   : > { %p569_p4 = pnand %p568_p2, %p567_p12  ;;  %p573_p11 = scmp.lt.u32.totalorder %s571_s26, %s566_s6 }
  0x2d   : > { %p575_p1 = scmp.lt.u32.totalorder %s566_s6, %s800_s29 }
  0x2e   : > { %p570_p6 = pneg %p569_p4  ;;  %p574_p5 = por %p573_p11, %p572_p10 }
  0x30   : > { %p576_p7 = por %p575_p1, %p574_p5 }
  0x32   : > { %p577_p9 = pnand %p576_p7, %p570_p6 }
  0x34   : > { %580 = shalt.err (!%p577_p9)
}
  0x35   : > { %s581_s17 = scalar_lea.vmem %s802_s3, 2048  ;;  %s685_s23 = smov [#allocation6]  }
  0x36   : > { %p582_p12 = scmp.ne.s32.totalorder %s802_s3, %s581_s17  ;;  %s586_s27 = sshll.u32 %s685_s23, 4  ;;  %s587_s27 = int_to_ptr.vmem [resolvable:$false] %s586_s27 }
  0x37   : > { %s588_s28 = scalar_lea.vmem %s587_s27, 4096  ;;  %p589_p3 = scmp.lt.s32.totalorder %s802_s3, %s587_s27 }
  0x38   : > { %p584_p4 = pnand %p582_p12, %p568_p2  ;;  %p590_p10 = scmp.lt.s32.totalorder %s588_s28, %s581_s17 }
  0x3a   : > { %p585_p8 = pneg %p584_p4  ;;  %p591_p11 = por %p590_p10, %p589_p3 }
  0x3c   : > { %p592_p5 = pnand %p591_p11, %p585_p8 }
  0x3e   : > { %595 = shalt.err (!%p592_p5)
}
  0x3f   : > { %s686_s30 = smov 128   ;;  %s687_s6 = smov 8  }
  0x40   : > { %491 = dma.hbm_to_vmem [thread:$0]  (!%p773_p0), %s800_s29, 2048, %s802_s3, %s809_s5, %s686_s30, %s686_s30, %s687_s6  }
  0x41   : > { %174 = sbr.rel (%p765_p13) target bundleno = 110 (0x6e), region = 28  ;;  %p992_p9 = scmp.ne.s32.totalorder (!%p765_p13), %s986_s18, 0 }
  0x48   : > { %649 = dma.done.wait (%p992_p9), [#allocation5], 16  }
  0x49   : > { %651 = vsyncadd (%p992_p9), [#allocation5], 4294967280  ;;  %s844_s7 = sand.u32 1, %s666_s10   ;;  %p993_p3 = scmp.ne.s32.totalorder %s987_s19, 0 }
  0x4a   : > { %s432_s8 = sshll.u32 %s844_s7, 7  ;;  %s181_s26 = scalar_lea.sflag [#allocation3], %s844_s7 }
  0x4b   : > { %s850_s24 = scalar_lea.vmem [#allocation6], %s432_s8 }
  0x4c   : > { %653 = dma.done.wait (%p993_p3), %s181_s26, 2048  }
  0x4d   : > { %655 = vsyncadd (%p993_p3), %s181_s26, 4294965248 }
  0x4e   : > { %189 = sfence }
  0x4f   : > { %s211_s18 = sld [smem:[#allocation2]]  ;;  %s434_s22 = sld [smem:[#allocation2 + $0x1]]  ;;  %v212_v0 = vld [vmem:[%s850_s24] sm:$0xff]  ;;  %v213_v1 = vld [vmem:[%s850_s24 + $0x8] sm:$0xff]  ;;  %v435_v2 = vld [vmem:[%s850_s24 + $0x10] sm:$0xff]  ;;  %vm217_vm0 = vcmask 130048  }
  0x50   : > { %s439_s29 = sld [smem:[#allocation2 + $0x2]]  ;;  %s856_s3 = sld [smem:[#allocation2 + $0x3]]  ;;  %v436_v3 = vld [vmem:[%s850_s24 + $0x18] sm:$0xff]  ;;  %v440_v4 = vld [vmem:[%s850_s24 + $0x20] sm:$0xff]  ;;  %v441_v5 = vld [vmem:[%s850_s24 + $0x28] sm:$0xff] }
  0x51   : > { %s859_s5 = sld [smem:[#allocation2 + $0x4]]  ;;  %s863_s19 = sld [smem:[#allocation2 + $0x5]]  ;;  %v445_v7 = vld [vmem:[%s850_s24 + $0x30] sm:$0xff]  ;;  %v446_v8 = vld [vmem:[%s850_s24 + $0x38] sm:$0xff]  ;;  %v450_v13 = vld [vmem:[%s850_s24 + $0x40] sm:$0xff] }
  0x52   : > { %s865_s15 = sld [smem:[#allocation2 + $0x6]]  ;;  %s870_s16 = sld [smem:[#allocation2 + $0x7]]  ;;  %v451_v14 = vld [vmem:[%s850_s24 + $0x48] sm:$0xff]  ;;  %v455_v19 = vld [vmem:[%s850_s24 + $0x50] sm:$0xff]  ;;  %v456_v20 = vld [vmem:[%s850_s24 + $0x58] sm:$0xff] }
  0x53   : > { %s880_s17 = scalar_lea.vmem [#allocation7], %s432_s8  ;;  %v460_v23 = vld [vmem:[%s850_s24 + $0x60] sm:$0xff]  ;;  %v461_v24 = vld [vmem:[%s850_s24 + $0x68] sm:$0xff]  ;;  %s475_s23 = sshll.u32 %s674_s12, 11  ;;  %v465_v29 = vld [vmem:[%s850_s24 + $0x70] sm:$0xff] }
  0x54   : > { %v466_v30 = vld [vmem:[%s850_s24 + $0x78] sm:$0xff]  ;;  %s316_s27 = sshll.u32 %s880_s17, 4  ;;  %s916_s30 = scalar_lea.hbm %s981_s2, %s475_s23  ;;  %s918_s27 = int_to_ptr.vmem [resolvable:$true] %s316_s27 }
  0x55   : > { %v214_v6 = vstv %s211_s18  ;;  %v225_v11 = vstv %s434_s22  ;;  %s298_s6 = scalar_lea.sflag [#allocation4], %s844_s7  ;;  %s596_s8 = scalar_lea.vmem %s918_s27, 2048 }
  0x56   : > { %v215_v9 = vmul.f32 %v214_v6, %v212_v0  ;;  %v216_v10 = vmul.f32 %v214_v6, %v213_v1  ;;  %v236_v12 = vstv %s439_s29  ;;  %v226_v15 = vmul.f32 %v435_v2, %v225_v11  ;;  %p597_p8 = scmp.ne.s32.totalorder %s918_s27, %s596_s8  ;;  %p994_p13 = scmp.ne.s32.totalorder %s988_s20, 0 }
  0x57   : > { %v227_v16 = vmul.f32 %v436_v3, %v225_v11  ;;  %v237_v17 = vmul.f32 %v440_v4, %v236_v12  ;;  %v238_v18 = vmul.f32 %v441_v5, %v236_v12  ;;  %v247_v21 = vstv %s856_s3  ;;  %s688_s26 = smov [#allocation7]  }
  0x58   : > { %218 = vst.msk [vmem:[%s880_s17] sm:$0xff] %vm217_vm0, %v215_v9  ;;  %219 = vst.msk [vmem:[%s880_s17 + $0x8] sm:$0xff] %vm217_vm0, %v216_v10  ;;  %v258_v22 = vstv %s859_s5  ;;  %v248_v25 = vmul.f32 %v445_v7, %v247_v21  ;;  %v249_v26 = vmul.f32 %v446_v8, %v247_v21  ;;  %v269_v31 = vstv %s863_s19  ;;  %p598_p0 = pnand %p597_p8, %p994_p13  ;;  %s600_s24 = sshll.u32 %s688_s26, 4  ;;  %s601_s24 = int_to_ptr.vmem [resolvable:$false] %s600_s24 }
  0x59   : > { %437 = vst.msk [vmem:[%s880_s17 + $0x10] sm:$0xff] %vm217_vm0, %v226_v15  ;;  %438 = vst.msk [vmem:[%s880_s17 + $0x18] sm:$0xff] %vm217_vm0, %v227_v16  ;;  %v259_v27 = vmul.f32 %v450_v13, %v258_v22  ;;  %v260_v28 = vmul.f32 %v451_v14, %v258_v22  ;;  %v280_v32 = vstv %s865_s15  ;;  %v291_v33 = vstv %s870_s16  ;;  %s602_s18 = scalar_lea.vmem %s601_s24, 4096  ;;  %p603_p6 = scmp.lt.s32.totalorder %s918_s27, %s601_s24 }
  0x5a   : > { %442 = vst.msk [vmem:[%s880_s17 + $0x20] sm:$0xff] %vm217_vm0, %v237_v17  ;;  %443 = vst.msk [vmem:[%s880_s17 + $0x28] sm:$0xff] %vm217_vm0, %v238_v18  ;;  %v270_v34 = vmul.f32 %v455_v19, %v269_v31  ;;  %v271_v35 = vmul.f32 %v456_v20, %v269_v31  ;;  %v281_v36 = vmul.f32 %v460_v23, %v280_v32  ;;  %p599_p2 = pneg %p598_p0  ;;  %p604_p1 = scmp.lt.s32.totalorder %s602_s18, %s596_s8 }
  0x5b   : > { %447 = vst.msk [vmem:[%s880_s17 + $0x30] sm:$0xff] %vm217_vm0, %v248_v25  ;;  %448 = vst.msk [vmem:[%s880_s17 + $0x38] sm:$0xff] %vm217_vm0, %v249_v26  ;;  %v282_v37 = vmul.f32 %v461_v24, %v280_v32  ;;  %v292_v38 = vmul.f32 %v465_v29, %v291_v33  ;;  %v293_v39 = vmul.f32 %v466_v30, %v291_v33 }
  0x5c   : > { %452 = vst.msk [vmem:[%s880_s17 + $0x40] sm:$0xff] %vm217_vm0, %v259_v27  ;;  %453 = vst.msk [vmem:[%s880_s17 + $0x48] sm:$0xff] %vm217_vm0, %v260_v28  ;;  %p605_p7 = por %p604_p1, %p603_p6 }
  0x5d   : > { %457 = vst.msk [vmem:[%s880_s17 + $0x50] sm:$0xff] %vm217_vm0, %v270_v34  ;;  %458 = vst.msk [vmem:[%s880_s17 + $0x58] sm:$0xff] %vm217_vm0, %v271_v35 }
  0x5e   : > { %462 = vst.msk [vmem:[%s880_s17 + $0x60] sm:$0xff] %vm217_vm0, %v281_v36  ;;  %463 = vst.msk [vmem:[%s880_s17 + $0x68] sm:$0xff] %vm217_vm0, %v282_v37  ;;  %p606_p12 = pnand %p605_p7, %p599_p2 }
  0x5f   : > { %467 = vst.msk [vmem:[%s880_s17 + $0x70] sm:$0xff] %vm217_vm0, %v292_v38  ;;  %468 = vst.msk [vmem:[%s880_s17 + $0x78] sm:$0xff] %vm217_vm0, %v293_v39 }
  0x60   : > { %609 = shalt.err (!%p606_p12)
}
  0x61   : > { %s610_s22 = scalar_lea.hbm %s916_s30, 2048  ;;  %s614_s5 = scalar_lea.hbm %s981_s2, 4096 }
  0x62   : > { %p611_p4 = scmp.ne.s32.totalorder %s916_s30, %s610_s22  ;;  %p615_p5 = scmp.lt.u32.totalorder %s916_s30, %s981_s2 }
  0x63   : > { %p616_p9 = scmp.lt.u32.totalorder %s614_s5, %s610_s22  ;;  %p618_p8 = scmp.lt.u32.totalorder %s610_s22, %s916_s30 }
  0x64   : > { %p612_p10 = pnand %p611_p4, %p994_p13 }
  0x65   : > { %p617_p3 = por %p616_p9, %p615_p5 }
  0x66   : > { %p613_p11 = pneg %p612_p10 }
  0x67   : > { %p619_p0 = por %p618_p8, %p617_p3 }
  0x69   : > { %p620_p2 = pnand %p619_p0, %p613_p11 }
  0x6b   : > { %623 = shalt.err (!%p620_p2)
}
  0x6c   : > { %s689_s16 = smov 128   ;;  %s690_s17 = smov 8  }
  0x6d   : > { %482 = dma.vmem_to_hbm [thread:$0]  (%p994_p13), %s918_s27, 2048, %s916_s30, %s298_s6, %s689_s16, %s689_s16, %s690_s17  }
  0x6e PF: > { %s331_s23 = sand.u32 1, %s662_s9   ;;  %p995_p6 = scmp.ne.s32.totalorder %s989_s21, 0 }
  0x6f   : > { %p996_p1 = scmp.ge.s32.totalorder %s682_s14, 2  ;;  %s332_s12 = scalar_lea.sflag [#allocation4], %s331_s23 }
  0x71   : > { %p493_p7 = pnand %p996_p1, %p995_p6 }
  0x73   : > { %657 = dma.done.wait (!%p493_p7), %s332_s12, 2048  }
  0x74   : > { %659 = vsyncadd (!%p493_p7), %s332_s12, 4294965248  ;;  %s19_s14 = sadd.s32 1, %s682_s14   ;;  %s997_s9 = smov %s666_s10 }
  0x75   : > { %p16_p12 = scmp.ge.s32.totalorder %s19_s14, 4   ;;  %s998_s10 = smov %s670_s11 }
  0x76   : > { %s999_s11 = smov %s807_s4  ;;  %s1000_s12 = smov %s678_s13 }
  0x77   : > { %s1001_s13 = smov %s1003_s25  ;;  %18 = sbr.rel (!%p16_p12) target bundleno = 7 (0x7), region = 92 }
  0x7e   :  { %337 = vsyncpa [#allocation3], 1 }
  0x7f   :  { %339 = vsyncpa [#allocation3 + $0x1], 1 }
  0x80   :  { %340 = vsyncpa [#allocation4], 1 }
  0x81   :  { %342 = vsyncpa [#allocation4 + $0x1], 1 }
  0x82   :  { %343 = vsyncpa [#allocation5], 1 }
  0x83   :  { %345 = vsyncpa [#allocation5 + $0x1], 1 }

</bundles_post_ra>
